<compile_context>
chip_gen: v7x
topology: tpu7x:2x2x1
jax: 0.10.0
libtpu: 0.0.40
codegen_flags: <defaults>
</compile_context>

<pallas_src>
import functools
import math

import jax
import jax.numpy as jnp
from jax.experimental import pallas as pl
from jax.experimental.pallas import tpu as pltpu


# ----------------------------------------------------------------------------
# Generation-aware VMEM budget: 3/4 of physical, capped at 100 MiB.
#   v5e / v6e (128 MiB physical) -> 96 MiB; v7x (64 MiB physical) -> 48 MiB.
# ----------------------------------------------------------------------------
def _vmem_limit_bytes():
    try:
        info = pltpu.get_tpu_info()
        phys = int(getattr(info, "vmem_capacity_bytes", 0) or 0)
        if phys > 0:
            return min((phys * 3) // 4, 100 * 1024 * 1024)
    except Exception:
        pass
    return 48 * 1024 * 1024  # safe default (fits v7x)


_VMEM_LIMIT = _vmem_limit_bytes()


# ----------------------------------------------------------------------------
# Helpers
# ----------------------------------------------------------------------------
def _gelu_exact(x):
    # matches torch.nn.functional.gelu (erf formulation) == ACT2FN['gelu']
    return 0.5 * x * (1.0 + jax.lax.erf(x * (1.0 / math.sqrt(2.0))))


def _bf16(x):
    return x.astype(jnp.bfloat16)


# ----------------------------------------------------------------------------
# Kernel A: fc1 + GELU + self-attention (+ residual), one batch per program.
# Output handed off in bf16.
# ----------------------------------------------------------------------------
def _self_block_kernel(x_ref, mask_ref,
                       w1_ref, b1_ref,
                       wqkv_ref, bqkv_ref,
                       wo_ref, bo_ref,
                       o_ref,
                       *, num_heads, head_dim):
    D = num_heads * head_dim
    x = x_ref[0]          # (T, outer) f32
    mask = mask_ref[0]    # (T, T) bf16 additive mask (promotes to f32 on add)

    # fc1 + exact GELU (activation dropout = identity in eval)
    h = jnp.dot(_bf16(x), w1_ref[...],
                preferred_element_type=jnp.float32) + b1_ref[...]
    h = _gelu_exact(h)                                  # (T, D) f32, residual

    # fused Q|K|V projection; 1/sqrt(head_dim) already folded into Q cols.
    qkv = jnp.dot(_bf16(h), wqkv_ref[...],
                  preferred_element_type=jnp.float32) + bqkv_ref[...]

    # NOTE: static Python loop is fine for small num_heads; use a fori_loop /
    # head grid axis if num_heads >= 16 to bound live ranges.
    out = None
    for head in range(num_heads):
        sl = slice(head * head_dim, (head + 1) * head_dim)
        q_h = _bf16(qkv[:, sl])
        k_h = _bf16(qkv[:, D + head * head_dim: D + (head + 1) * head_dim])
        v_h = _bf16(qkv[:, 2 * D + head * head_dim: 2 * D + (head + 1) * head_dim])

        s = jax.lax.dot_general(q_h, k_h, (((1,), (1,)), ((), ())),
                                preferred_element_type=jnp.float32)
        s = s + mask
        s = s - jnp.max(s, axis=-1, keepdims=True)
        p = jnp.exp(s)
        p = p * pl.reciprocal(jnp.sum(p, axis=-1, keepdims=True), approx=True)
        head_out = jnp.dot(_bf16(p), v_h, preferred_element_type=jnp.float32)

        # out_proj fused per head; layer_head_mask pre-folded into wo rows.
        contrib = jnp.dot(_bf16(head_out), wo_ref[sl, :],
                          preferred_element_type=jnp.float32)
        out = contrib if out is None else out + contrib

    # residual + out_proj bias; bf16 hand-off to kernel B.
    o_ref[0] = (h + out + bo_ref[...]).astype(o_ref.dtype)


def self_attention_block(x, self_mask, head_mask, p, *, num_heads):
    B, T, outer = x.shape
    D = p["fc1_w"].shape[1]
    head_dim = D // num_heads
    scaling = head_dim ** -0.5

    # Host-side constant folds on weights (exact algebra):
    #   * scaling into Wq / bq,
    #   * per-head mask into the out_proj rows feeding each head.
    wqkv = jnp.concatenate([p["sa_qw"] * scaling, p["sa_kw"], p["sa_vw"]], axis=1)
    bqkv = jnp.concatenate([p["sa_qb"] * scaling, p["sa_kb"], p["sa_vb"]]
                           ).reshape(1, 3 * D)
    wo = p["sa_ow"] * jnp.repeat(head_mask, head_dim)[:, None]

    kernel = functools.partial(_self_block_kernel, num_heads=num_heads,
                               head_dim=head_dim)
    const = lambda shape: pl.BlockSpec(shape, lambda b: (0, 0))
    return pl.pallas_call(
        kernel,
        out_shape=jax.ShapeDtypeStruct((B, T, D), jnp.bfloat16),
        grid=(B,),
        in_specs=[
            pl.BlockSpec((1, T, outer), lambda b: (b, 0, 0)),   # x
            pl.BlockSpec((1, T, T), lambda b: (b, 0, 0)),       # self mask (bf16)
            const((outer, D)), const((1, D)),                   # fc1
            const((D, 3 * D)), const((1, 3 * D)),               # packed q|k|v
            const((D, D)), const((1, D)),                       # out_proj
        ],
        out_specs=pl.BlockSpec((1, T, D), lambda b: (b, 0, 0)),
        compiler_params=pltpu.CompilerParams(
            dimension_semantics=("parallel",),
            vmem_limit_bytes=_VMEM_LIMIT),
    )(x, _bf16(self_mask),
      _bf16(p["fc1_w"]), p["fc1_b"].reshape(1, D),
      _bf16(wqkv), bqkv,
      _bf16(wo), p["sa_ob"].reshape(1, D))


# ----------------------------------------------------------------------------
# Kernel B: cross-attention (+ residual) + fc2 + GELU + residual + final LN.
# ----------------------------------------------------------------------------
def _cross_block_kernel(h_ref, kv_ref, mask_ref,
                        wq_ref, bq_ref, wkv_ref, bkv_ref,
                        wo_ref, bo_ref,
                        w2_ref, b2_ref, g_ref, beta_ref,
                        o_ref,
                        *, num_heads, head_dim):
    D = num_heads * head_dim
    hb = h_ref[0]                      # (T, D) bf16 (kernel-A output)
    h = hb.astype(jnp.float32)         # cross-attn residual
    mask = mask_ref[0]                 # (T, S) bf16 additive mask

    # Q from decoder states (scaling folded), packed K|V from encoder states.
    q = jnp.dot(hb, wq_ref[...], preferred_element_type=jnp.float32) + bq_ref[...]
    kvp = jnp.dot(_bf16(kv_ref[0]), wkv_ref[...],
                  preferred_element_type=jnp.float32) + bkv_ref[...]

    out = None
    for head in range(num_heads):
        sl = slice(head * head_dim, (head + 1) * head_dim)
        q_h = _bf16(q[:, sl])
        k_h = _bf16(kvp[:, sl])
        v_h = _bf16(kvp[:, D + head * head_dim: D + (head + 1) * head_dim])

        s = jax.lax.dot_general(q_h, k_h, (((1,), (1,)), ((), ())),
                                preferred_element_type=jnp.float32)
        s = s + mask
        s = s - jnp.max(s, axis=-1, keepdims=True)
        p = jnp.exp(s)
        p = p * pl.reciprocal(jnp.sum(p, axis=-1, keepdims=True), approx=True)
        head_out = jnp.dot(_bf16(p), v_h, preferred_element_type=jnp.float32)

        contrib = jnp.dot(_bf16(head_out), wo_ref[sl, :],
                          preferred_element_type=jnp.float32)
        out = contrib if out is None else out + contrib

    h2 = h + out + bo_ref[...]

    # fc2 + GELU + residual + final LayerNorm (all f32 elementwise)
    t = _gelu_exact(jnp.dot(_bf16(h2), w2_ref[...],
                            preferred_element_type=jnp.float32) + b2_ref[...])
    y = h2 + t
    mean = jnp.mean(y, axis=-1, keepdims=True)
    var = jnp.mean((y - mean) * (y - mean), axis=-1, keepdims=True)
    yn = (y - mean) * jax.lax.rsqrt(var + 1e-5)
    o_ref[0] = yn * g_ref[...] + beta_ref[...]


def cross_ffn_block(h, enc, enc_mask, p, *, num_heads):
    B, T, D = h.shape
    S = enc.shape[1]
    head_dim = D // num_heads
    scaling = head_dim ** -0.5

    wkv = jnp.concatenate([p["ca_kw"], p["ca_vw"]], axis=1)
    bkv = jnp.concatenate([p["ca_kb"], p["ca_vb"]]).reshape(1, 2 * D)

    kernel = functools.partial(_cross_block_kernel, num_heads=num_heads,
                               head_dim=head_dim)
    const = lambda shape: pl.BlockSpec(shape, lambda b: (0, 0))
    return pl.pallas_call(
        kernel,
        out_shape=jax.ShapeDtypeStruct((B, T, D), jnp.float32),
        grid=(B,),
        in_specs=[
            pl.BlockSpec((1, T, D), lambda b: (b, 0, 0)),       # h (bf16)
            pl.BlockSpec((1, S, D), lambda b: (b, 0, 0)),       # encoder states
            pl.BlockSpec((1, T, S), lambda b: (b, 0, 0)),       # enc mask (bf16)
            const((D, D)), const((1, D)),                       # q (scaled)
            const((D, 2 * D)), const((1, 2 * D)),               # packed k|v
            const((D, D)), const((1, D)),                       # out_proj
            const((D, D)), const((1, D)),                       # fc2
            const((1, D)), const((1, D)),                       # LN gamma / beta
        ],
        out_specs=pl.BlockSpec((1, T, D), lambda b: (b, 0, 0)),
        compiler_params=pltpu.CompilerParams(
            dimension_semantics=("parallel",),
            vmem_limit_bytes=_VMEM_LIMIT),
    )(h, enc, _bf16(enc_mask),
      _bf16(p["ca_qw"] * scaling), (p["ca_qb"] * scaling).reshape(1, D),
      _bf16(wkv), bkv,
      _bf16(p["ca_ow"]), p["ca_ob"].reshape(1, D),
      _bf16(p["fc2_w"]), p["fc2_b"].reshape(1, D),
      p["ln_g"].reshape(1, D), p["ln_b"].reshape(1, D))


# ----------------------------------------------------------------------------
# Full ExtendDecoderLayer forward (two fused Pallas kernels)
# ----------------------------------------------------------------------------
def extend_decoder_layer(params, hidden_pos_states, attention_mask,
                         encoder_attention_mask, encoder_hidden_pos_states,
                         layer_head_mask, *, num_heads):
    B, T, _ = hidden_pos_states.shape
    S = encoder_hidden_pos_states.shape[1]
    self_mask = attention_mask.reshape(B, T, T)          # (B,1,T,T) -> (B,T,T)
    enc_mask = encoder_attention_mask.reshape(B, T, S)
    h = self_attention_block(hidden_pos_states, self_mask, layer_head_mask,
                             params, num_heads=num_heads)
    return cross_ffn_block(h, encoder_hidden_pos_states, enc_mask,
                           params, num_heads=num_heads)


# ----------------------------------------------------------------------------
# Pure-JAX reference (mirrors the kernels' bf16-operand / f32-accumulate dots
# and the bf16 inter-kernel hand-off)
# ----------------------------------------------------------------------------
def _bdot_ref(a, b):
    return jnp.dot(a.astype(jnp.bfloat16), b.astype(jnp.bfloat16),
                   preferred_element_type=jnp.float32)


def _ref_attn(h, kv, mask4, head_mask, wq, bq, wk, bk, wv, bv, wo, bo, num_heads):
    B, T, D = h.shape
    S = kv.shape[1]
    hd = D // num_heads
    scaling = hd ** -0.5
    q = (_bdot_ref(h, wq) + bq) * scaling
    k = _bdot_ref(kv, wk) + bk
    v = _bdot_ref(kv, wv) + bv
    qh = q.reshape(B, T, num_heads, hd).transpose(0, 2, 1, 3)
    kh = k.reshape(B, S, num_heads, hd).transpose(0, 2, 1, 3)
    vh = v.reshape(B, S, num_heads, hd).transpose(0, 2, 1, 3)
    s = jnp.einsum("bhtd,bhsd->bhts", qh.astype(jnp.bfloat16),
                   kh.astype(jnp.bfloat16),
                   preferred_element_type=jnp.float32) + mask4
    p = jax.nn.softmax(s, axis=-1)
    o = jnp.einsum("bhts,bhsd->bhtd", p.astype(jnp.bfloat16),
                   vh.astype(jnp.bfloat16),
                   preferred_element_type=jnp.float32)
    if head_mask is not None:
        o = o * head_mask.reshape(1, num_heads, 1, 1)
    o = o.transpose(0, 2, 1, 3).reshape(B, T, D)
    return h + (_bdot_ref(o, wo) + bo)


def _ref_layer(p, x, self_mask4, enc_mask4, enc_h, head_mask, num_heads):
    h = _gelu_exact(_bdot_ref(x, p["fc1_w"]) + p["fc1_b"])
    h = _ref_attn(h, h, self_mask4, head_mask,
                  p["sa_qw"], p["sa_qb"], p["sa_kw"], p["sa_kb"],
                  p["sa_vw"], p["sa_vb"], p["sa_ow"], p["sa_ob"], num_heads)
    # mirror the kernel-A -> kernel-B bf16 hand-off
    h = h.astype(jnp.bfloat16).astype(jnp.float32)
    h = _ref_attn(h, enc_h, enc_mask4, None,
                  p["ca_qw"], p["ca_qb"], p["ca_kw"], p["ca_kb"],
                  p["ca_vw"], p["ca_vb"], p["ca_ow"], p["ca_ob"], num_heads)
    t = _gelu_exact(_bdot_ref(h, p["fc2_w"]) + p["fc2_b"])
    y = h + t
    mean = jnp.mean(y, axis=-1, keepdims=True)
    var = jnp.mean((y - mean) ** 2, axis=-1, keepdims=True)
    return (y - mean) * jax.lax.rsqrt(var + 1e-5) * p["ln_g"] + p["ln_b"]


# ----------------------------------------------------------------------------
if __name__ == "__main__":
    B, T, S = 2, 8, 16
    embed_dim, num_heads, outer_dim = 32, 4, 48

    key = jax.random.PRNGKey(0)
    ks = jax.random.split(key, 24)

    def w(k, shape):
        return (0.02 * jax.random.normal(k, shape)).astype(jnp.float32)

    params = {
        "fc1_w": w(ks[0], (outer_dim, embed_dim)), "fc1_b": w(ks[1], (embed_dim,)),
        "sa_qw": w(ks[2], (embed_dim, embed_dim)), "sa_qb": w(ks[3], (embed_dim,)),
        "sa_kw": w(ks[4], (embed_dim, embed_dim)), "sa_kb": w(ks[5], (embed_dim,)),
        "sa_vw": w(ks[6], (embed_dim, embed_dim)), "sa_vb": w(ks[7], (embed_dim,)),
        "sa_ow": w(ks[8], (embed_dim, embed_dim)), "sa_ob": w(ks[9], (embed_dim,)),
        "ca_qw": w(ks[10], (embed_dim, embed_dim)), "ca_qb": w(ks[11], (embed_dim,)),
        "ca_kw": w(ks[12], (embed_dim, embed_dim)), "ca_kb": w(ks[13], (embed_dim,)),
        "ca_vw": w(ks[14], (embed_dim, embed_dim)), "ca_vb": w(ks[15], (embed_dim,)),
        "ca_ow": w(ks[16], (embed_dim, embed_dim)), "ca_ob": w(ks[17], (embed_dim,)),
        "fc2_w": w(ks[18], (embed_dim, embed_dim)), "fc2_b": w(ks[19], (embed_dim,)),
        "ln_g": jnp.ones((embed_dim,), jnp.float32),
        "ln_b": jnp.zeros((embed_dim,), jnp.float32),
    }

    x = jax.random.normal(ks[20], (B, T, outer_dim), jnp.float32)
    enc_h = jax.random.normal(ks[21], (B, S, embed_dim), jnp.float32)

    # causal additive self-attention mask (B, 1, T, T)
    causal = jnp.where(jnp.arange(T)[None, :] <= jnp.arange(T)[:, None], 0.0, -1e9)
    attention_mask = jnp.broadcast_to(causal, (B, 1, T, T)).astype(jnp.float32)
    # encoder attention mask (B, 1, T, S): mask last 4 encoder positions for batch 1
    enc_mask = jnp.zeros((B, 1, T, S), jnp.float32)
    enc_mask = enc_mask.at[1, 0, :, S - 4:].set(-1e9)
    layer_head_mask = jax.random.uniform(ks[22], (num_heads,), jnp.float32,
                                         minval=0.5, maxval=1.0)

    out = extend_decoder_layer(params, x, attention_mask, enc_mask, enc_h,
                               layer_head_mask, num_heads=num_heads)
    out = jax.block_until_ready(out)

    ref = _ref_layer(params, x, attention_mask, enc_mask, enc_h,
                     layer_head_mask, num_heads)
    assert out.shape == (B, T, embed_dim)
    # tolerance absorbs approx-reciprocal softmax, bf16 weight-fold rounding,
    # and accumulation-order deltas
    assert jnp.max(jnp.abs(out - ref)) < 2e-2, float(jnp.max(jnp.abs(out - ref)))

    print("KERNEL_OK")
</pallas_src>

<mosaic_0001>
module attributes {stable_mosaic.version = 11 : i64} {
  func.func @_self_block_kernel(%arg0: i32, %arg1: memref<1x8x48xf32, #tpu.memory_space<vmem>>, %arg2: memref<1x8x8xbf16, #tpu.memory_space<vmem>>, %arg3: memref<48x32xbf16, #tpu.memory_space<vmem>>, %arg4: memref<1x32xf32, #tpu.memory_space<vmem>>, %arg5: memref<32x96xbf16, #tpu.memory_space<vmem>>, %arg6: memref<1x96xf32, #tpu.memory_space<vmem>>, %arg7: memref<32x32xbf16, #tpu.memory_space<vmem>>, %arg8: memref<1x32xf32, #tpu.memory_space<vmem>>, %arg9: memref<1x8x32xbf16, #tpu.memory_space<vmem>>) attributes {dimension_semantics = [#tpu.dimension_semantics<parallel>], iteration_bounds = array<i64: 2>, scalar_prefetch = 0 : i64, scratch_operands = 0 : i64, tpu.core_type = #tpu.core_type<tc>, window_params = [{transform_indices = @transform_0, window_bounds = array<i64: 1, 8, 48>}, {transform_indices = @transform_1, window_bounds = array<i64: 1, 8, 8>}, {pipeline_mode = #tpu.pipeline_mode<synchronous>, transform_indices = @transform_2, window_bounds = array<i64: 48, 32>}, {pipeline_mode = #tpu.pipeline_mode<synchronous>, transform_indices = @transform_3, window_bounds = array<i64: 1, 32>}, {pipeline_mode = #tpu.pipeline_mode<synchronous>, transform_indices = @transform_4, window_bounds = array<i64: 32, 96>}, {pipeline_mode = #tpu.pipeline_mode<synchronous>, transform_indices = @transform_5, window_bounds = array<i64: 1, 96>}, {pipeline_mode = #tpu.pipeline_mode<synchronous>, transform_indices = @transform_6, window_bounds = array<i64: 32, 32>}, {pipeline_mode = #tpu.pipeline_mode<synchronous>, transform_indices = @transform_7, window_bounds = array<i64: 1, 32>}, {transform_indices = @transform_8, window_bounds = array<i64: 1, 8, 32>}]} {
    %c0 = arith.constant 0 : index
    %c0_0 = arith.constant 0 : index
    %c0_1 = arith.constant 0 : index
    %0 = vector.load %arg1[%c0, %c0_0, %c0_1] : memref<1x8x48xf32, #tpu.memory_space<vmem>>, vector<1x8x48xf32>
    %1 = vector.shape_cast %0 : vector<1x8x48xf32> to vector<8x48xf32>
    %c0_2 = arith.constant 0 : index
    %c0_3 = arith.constant 0 : index
    %c0_4 = arith.constant 0 : index
    %2 = vector.load %arg2[%c0_2, %c0_3, %c0_4] : memref<1x8x8xbf16, #tpu.memory_space<vmem>>, vector<1x8x8xbf16>
    %3 = vector.shape_cast %2 : vector<1x8x8xbf16> to vector<8x8xbf16>
    %4 = arith.truncf %1 : vector<8x48xf32> to vector<8x48xbf16>
    %c0_5 = arith.constant 0 : index
    %c0_6 = arith.constant 0 : index
    %5 = vector.load %arg3[%c0_5, %c0_6] : memref<48x32xbf16, #tpu.memory_space<vmem>>, vector<48x32xbf16>
    %cst = arith.constant dense<0.000000e+00> : vector<8x32xf32>
    %6 = tpu.matmul %4, %5, %cst {dimension_numbers = #tpu.dot_dimension_numbers<[1], [0], [0], [1], [0, 0, 1, 1], [], []>} : vector<8x48xbf16>, vector<48x32xbf16>, vector<8x32xf32> -> vector<8x32xf32>
    %c0_7 = arith.constant 0 : index
    %c0_8 = arith.constant 0 : index
    %7 = vector.load %arg4[%c0_7, %c0_8] : memref<1x32xf32, #tpu.memory_space<vmem>>, vector<1x32xf32>
    %8 = vector.broadcast %7 : vector<1x32xf32> to vector<8x32xf32>
    %9 = arith.addf %6, %8 : vector<8x32xf32>
    %cst_9 = arith.constant 5.000000e-01 : f32
    %10 = vector.broadcast %cst_9 : f32 to vector<8x32xf32>
    %11 = arith.mulf %10, %9 : vector<8x32xf32>
    %cst_10 = arith.constant 0.707106769 : f32
    %12 = vector.broadcast %cst_10 : f32 to vector<8x32xf32>
    %13 = arith.mulf %9, %12 : vector<8x32xf32>
    %14 = math.erf %13 : vector<8x32xf32>
    %cst_11 = arith.constant 1.000000e+00 : f32
    %15 = vector.broadcast %cst_11 : f32 to vector<8x32xf32>
    %16 = arith.addf %15, %14 : vector<8x32xf32>
    %17 = arith.mulf %11, %16 : vector<8x32xf32>
    %18 = arith.truncf %17 : vector<8x32xf32> to vector<8x32xbf16>
    %c0_12 = arith.constant 0 : index
    %c0_13 = arith.constant 0 : index
    %19 = vector.load %arg5[%c0_12, %c0_13] : memref<32x96xbf16, #tpu.memory_space<vmem>>, vector<32x96xbf16>
    %cst_14 = arith.constant dense<0.000000e+00> : vector<8x96xf32>
    %20 = tpu.matmul %18, %19, %cst_14 {dimension_numbers = #tpu.dot_dimension_numbers<[1], [0], [0], [1], [0, 0, 1, 1], [], []>} : vector<8x32xbf16>, vector<32x96xbf16>, vector<8x96xf32> -> vector<8x96xf32>
    %c0_15 = arith.constant 0 : index
    %c0_16 = arith.constant 0 : index
    %21 = vector.load %arg6[%c0_15, %c0_16] : memref<1x96xf32, #tpu.memory_space<vmem>>, vector<1x96xf32>
    %22 = vector.broadcast %21 : vector<1x96xf32> to vector<8x96xf32>
    %23 = arith.addf %20, %22 : vector<8x96xf32>
    %24 = vector.extract_strided_slice %23 {offsets = [0, 0], sizes = [8, 8], strides = [1, 1]} : vector<8x96xf32> to vector<8x8xf32>
    %25 = arith.truncf %24 : vector<8x8xf32> to vector<8x8xbf16>
    %26 = vector.extract_strided_slice %23 {offsets = [0, 32], sizes = [8, 8], strides = [1, 1]} : vector<8x96xf32> to vector<8x8xf32>
    %27 = arith.truncf %26 : vector<8x8xf32> to vector<8x8xbf16>
    %28 = vector.extract_strided_slice %23 {offsets = [0, 64], sizes = [8, 8], strides = [1, 1]} : vector<8x96xf32> to vector<8x8xf32>
    %29 = arith.truncf %28 : vector<8x8xf32> to vector<8x8xbf16>
    %cst_17 = arith.constant dense<0.000000e+00> : vector<8x8xf32>
    %30 = tpu.matmul %25, %27, %cst_17 {dimension_numbers = #tpu.dot_dimension_numbers<[1], [1], [0], [0], [0, 0, 1, 0], [], []>} : vector<8x8xbf16>, vector<8x8xbf16>, vector<8x8xf32> -> vector<8x8xf32>
    %31 = arith.extf %3 : vector<8x8xbf16> to vector<8x8xf32>
    %32 = arith.addf %30, %31 : vector<8x8xf32>
    %cst_18 = arith.constant dense<0xFF800000> : vector<8xf32>
    %33 = vector.multi_reduction <maximumf>, %32, %cst_18 [1] : vector<8x8xf32> to vector<8xf32>
    %34 = vector.shape_cast %33 : vector<8xf32> to vector<8x1xf32>
    %35 = vector.broadcast %34 : vector<8x1xf32> to vector<8x8xf32>
    %36 = arith.subf %32, %35 : vector<8x8xf32>
    %37 = math.exp %36 : vector<8x8xf32>
    %cst_19 = arith.constant dense<0.000000e+00> : vector<8xf32>
    %38 = vector.multi_reduction <add>, %37, %cst_19 [1] : vector<8x8xf32> to vector<8xf32>
    %39 = vector.shape_cast %38 : vector<8xf32> to vector<8x1xf32>
    %40 = tpu.reciprocal %39 {approx = true} : vector<8x1xf32> -> vector<8x1xf32>
    %41 = vector.broadcast %40 : vector<8x1xf32> to vector<8x8xf32>
    %42 = arith.mulf %37, %41 : vector<8x8xf32>
    %43 = arith.truncf %42 : vector<8x8xf32> to vector<8x8xbf16>
    %cst_20 = arith.constant dense<0.000000e+00> : vector<8x8xf32>
    %44 = tpu.matmul %43, %29, %cst_20 {dimension_numbers = #tpu.dot_dimension_numbers<[1], [0], [0], [1], [0, 0, 1, 1], [], []>} : vector<8x8xbf16>, vector<8x8xbf16>, vector<8x8xf32> -> vector<8x8xf32>
    %45 = arith.truncf %44 : vector<8x8xf32> to vector<8x8xbf16>
    %c0_21 = arith.constant 0 : index
    %c0_22 = arith.constant 0 : index
    %46 = vector.load %arg7[%c0_21, %c0_22] : memref<32x32xbf16, #tpu.memory_space<vmem>>, vector<8x32xbf16>
    %cst_23 = arith.constant dense<0.000000e+00> : vector<8x32xf32>
    %47 = tpu.matmul %45, %46, %cst_23 {dimension_numbers = #tpu.dot_dimension_numbers<[1], [0], [0], [1], [0, 0, 1, 1], [], []>} : vector<8x8xbf16>, vector<8x32xbf16>, vector<8x32xf32> -> vector<8x32xf32>
    %48 = vector.extract_strided_slice %23 {offsets = [0, 8], sizes = [8, 8], strides = [1, 1]} : vector<8x96xf32> to vector<8x8xf32>
    %49 = arith.truncf %48 : vector<8x8xf32> to vector<8x8xbf16>
    %50 = vector.extract_strided_slice %23 {offsets = [0, 40], sizes = [8, 8], strides = [1, 1]} : vector<8x96xf32> to vector<8x8xf32>
    %51 = arith.truncf %50 : vector<8x8xf32> to vector<8x8xbf16>
    %52 = vector.extract_strided_slice %23 {offsets = [0, 72], sizes = [8, 8], strides = [1, 1]} : vector<8x96xf32> to vector<8x8xf32>
    %53 = arith.truncf %52 : vector<8x8xf32> to vector<8x8xbf16>
    %cst_24 = arith.constant dense<0.000000e+00> : vector<8x8xf32>
    %54 = tpu.matmul %49, %51, %cst_24 {dimension_numbers = #tpu.dot_dimension_numbers<[1], [1], [0], [0], [0, 0, 1, 0], [], []>} : vector<8x8xbf16>, vector<8x8xbf16>, vector<8x8xf32> -> vector<8x8xf32>
    %55 = arith.extf %3 : vector<8x8xbf16> to vector<8x8xf32>
    %56 = arith.addf %54, %55 : vector<8x8xf32>
    %cst_25 = arith.constant dense<0xFF800000> : vector<8xf32>
    %57 = vector.multi_reduction <maximumf>, %56, %cst_25 [1] : vector<8x8xf32> to vector<8xf32>
    %58 = vector.shape_cast %57 : vector<8xf32> to vector<8x1xf32>
    %59 = vector.broadcast %58 : vector<8x1xf32> to vector<8x8xf32>
    %60 = arith.subf %56, %59 : vector<8x8xf32>
    %61 = math.exp %60 : vector<8x8xf32>
    %cst_26 = arith.constant dense<0.000000e+00> : vector<8xf32>
    %62 = vector.multi_reduction <add>, %61, %cst_26 [1] : vector<8x8xf32> to vector<8xf32>
    %63 = vector.shape_cast %62 : vector<8xf32> to vector<8x1xf32>
    %64 = tpu.reciprocal %63 {approx = true} : vector<8x1xf32> -> vector<8x1xf32>
    %65 = vector.broadcast %64 : vector<8x1xf32> to vector<8x8xf32>
    %66 = arith.mulf %61, %65 : vector<8x8xf32>
    %67 = arith.truncf %66 : vector<8x8xf32> to vector<8x8xbf16>
    %cst_27 = arith.constant dense<0.000000e+00> : vector<8x8xf32>
    %68 = tpu.matmul %67, %53, %cst_27 {dimension_numbers = #tpu.dot_dimension_numbers<[1], [0], [0], [1], [0, 0, 1, 1], [], []>} : vector<8x8xbf16>, vector<8x8xbf16>, vector<8x8xf32> -> vector<8x8xf32>
    %69 = arith.truncf %68 : vector<8x8xf32> to vector<8x8xbf16>
    %c8 = arith.constant 8 : index
    %c0_28 = arith.constant 0 : index
    %70 = vector.load %arg7[%c8, %c0_28] : memref<32x32xbf16, #tpu.memory_space<vmem>>, vector<8x32xbf16>
    %cst_29 = arith.constant dense<0.000000e+00> : vector<8x32xf32>
    %71 = tpu.matmul %69, %70, %cst_29 {dimension_numbers = #tpu.dot_dimension_numbers<[1], [0], [0], [1], [0, 0, 1, 1], [], []>} : vector<8x8xbf16>, vector<8x32xbf16>, vector<8x32xf32> -> vector<8x32xf32>
    %72 = arith.addf %47, %71 : vector<8x32xf32>
    %73 = vector.extract_strided_slice %23 {offsets = [0, 16], sizes = [8, 8], strides = [1, 1]} : vector<8x96xf32> to vector<8x8xf32>
    %74 = arith.truncf %73 : vector<8x8xf32> to vector<8x8xbf16>
    %75 = vector.extract_strided_slice %23 {offsets = [0, 48], sizes = [8, 8], strides = [1, 1]} : vector<8x96xf32> to vector<8x8xf32>
    %76 = arith.truncf %75 : vector<8x8xf32> to vector<8x8xbf16>
    %77 = vector.extract_strided_slice %23 {offsets = [0, 80], sizes = [8, 8], strides = [1, 1]} : vector<8x96xf32> to vector<8x8xf32>
    %78 = arith.truncf %77 : vector<8x8xf32> to vector<8x8xbf16>
    %cst_30 = arith.constant dense<0.000000e+00> : vector<8x8xf32>
    %79 = tpu.matmul %74, %76, %cst_30 {dimension_numbers = #tpu.dot_dimension_numbers<[1], [1], [0], [0], [0, 0, 1, 0], [], []>} : vector<8x8xbf16>, vector<8x8xbf16>, vector<8x8xf32> -> vector<8x8xf32>
    %80 = arith.extf %3 : vector<8x8xbf16> to vector<8x8xf32>
    %81 = arith.addf %79, %80 : vector<8x8xf32>
    %cst_31 = arith.constant dense<0xFF800000> : vector<8xf32>
    %82 = vector.multi_reduction <maximumf>, %81, %cst_31 [1] : vector<8x8xf32> to vector<8xf32>
    %83 = vector.shape_cast %82 : vector<8xf32> to vector<8x1xf32>
    %84 = vector.broadcast %83 : vector<8x1xf32> to vector<8x8xf32>
    %85 = arith.subf %81, %84 : vector<8x8xf32>
    %86 = math.exp %85 : vector<8x8xf32>
    %cst_32 = arith.constant dense<0.000000e+00> : vector<8xf32>
    %87 = vector.multi_reduction <add>, %86, %cst_32 [1] : vector<8x8xf32> to vector<8xf32>
    %88 = vector.shape_cast %87 : vector<8xf32> to vector<8x1xf32>
    %89 = tpu.reciprocal %88 {approx = true} : vector<8x1xf32> -> vector<8x1xf32>
    %90 = vector.broadcast %89 : vector<8x1xf32> to vector<8x8xf32>
    %91 = arith.mulf %86, %90 : vector<8x8xf32>
    %92 = arith.truncf %91 : vector<8x8xf32> to vector<8x8xbf16>
    %cst_33 = arith.constant dense<0.000000e+00> : vector<8x8xf32>
    %93 = tpu.matmul %92, %78, %cst_33 {dimension_numbers = #tpu.dot_dimension_numbers<[1], [0], [0], [1], [0, 0, 1, 1], [], []>} : vector<8x8xbf16>, vector<8x8xbf16>, vector<8x8xf32> -> vector<8x8xf32>
    %94 = arith.truncf %93 : vector<8x8xf32> to vector<8x8xbf16>
    %c16 = arith.constant 16 : index
    %c0_34 = arith.constant 0 : index
    %95 = vector.load %arg7[%c16, %c0_34] : memref<32x32xbf16, #tpu.memory_space<vmem>>, vector<8x32xbf16>
    %cst_35 = arith.constant dense<0.000000e+00> : vector<8x32xf32>
    %96 = tpu.matmul %94, %95, %cst_35 {dimension_numbers = #tpu.dot_dimension_numbers<[1], [0], [0], [1], [0, 0, 1, 1], [], []>} : vector<8x8xbf16>, vector<8x32xbf16>, vector<8x32xf32> -> vector<8x32xf32>
    %97 = arith.addf %72, %96 : vector<8x32xf32>
    %98 = vector.extract_strided_slice %23 {offsets = [0, 24], sizes = [8, 8], strides = [1, 1]} : vector<8x96xf32> to vector<8x8xf32>
    %99 = arith.truncf %98 : vector<8x8xf32> to vector<8x8xbf16>
    %100 = vector.extract_strided_slice %23 {offsets = [0, 56], sizes = [8, 8], strides = [1, 1]} : vector<8x96xf32> to vector<8x8xf32>
    %101 = arith.truncf %100 : vector<8x8xf32> to vector<8x8xbf16>
    %102 = vector.extract_strided_slice %23 {offsets = [0, 88], sizes = [8, 8], strides = [1, 1]} : vector<8x96xf32> to vector<8x8xf32>
    %103 = arith.truncf %102 : vector<8x8xf32> to vector<8x8xbf16>
    %cst_36 = arith.constant dense<0.000000e+00> : vector<8x8xf32>
    %104 = tpu.matmul %99, %101, %cst_36 {dimension_numbers = #tpu.dot_dimension_numbers<[1], [1], [0], [0], [0, 0, 1, 0], [], []>} : vector<8x8xbf16>, vector<8x8xbf16>, vector<8x8xf32> -> vector<8x8xf32>
    %105 = arith.extf %3 : vector<8x8xbf16> to vector<8x8xf32>
    %106 = arith.addf %104, %105 : vector<8x8xf32>
    %cst_37 = arith.constant dense<0xFF800000> : vector<8xf32>
    %107 = vector.multi_reduction <maximumf>, %106, %cst_37 [1] : vector<8x8xf32> to vector<8xf32>
    %108 = vector.shape_cast %107 : vector<8xf32> to vector<8x1xf32>
    %109 = vector.broadcast %108 : vector<8x1xf32> to vector<8x8xf32>
    %110 = arith.subf %106, %109 : vector<8x8xf32>
    %111 = math.exp %110 : vector<8x8xf32>
    %cst_38 = arith.constant dense<0.000000e+00> : vector<8xf32>
    %112 = vector.multi_reduction <add>, %111, %cst_38 [1] : vector<8x8xf32> to vector<8xf32>
    %113 = vector.shape_cast %112 : vector<8xf32> to vector<8x1xf32>
    %114 = tpu.reciprocal %113 {approx = true} : vector<8x1xf32> -> vector<8x1xf32>
    %115 = vector.broadcast %114 : vector<8x1xf32> to vector<8x8xf32>
    %116 = arith.mulf %111, %115 : vector<8x8xf32>
    %117 = arith.truncf %116 : vector<8x8xf32> to vector<8x8xbf16>
    %cst_39 = arith.constant dense<0.000000e+00> : vector<8x8xf32>
    %118 = tpu.matmul %117, %103, %cst_39 {dimension_numbers = #tpu.dot_dimension_numbers<[1], [0], [0], [1], [0, 0, 1, 1], [], []>} : vector<8x8xbf16>, vector<8x8xbf16>, vector<8x8xf32> -> vector<8x8xf32>
    %119 = arith.truncf %118 : vector<8x8xf32> to vector<8x8xbf16>
    %c24 = arith.constant 24 : index
    %c0_40 = arith.constant 0 : index
    %120 = vector.load %arg7[%c24, %c0_40] : memref<32x32xbf16, #tpu.memory_space<vmem>>, vector<8x32xbf16>
    %cst_41 = arith.constant dense<0.000000e+00> : vector<8x32xf32>
    %121 = tpu.matmul %119, %120, %cst_41 {dimension_numbers = #tpu.dot_dimension_numbers<[1], [0], [0], [1], [0, 0, 1, 1], [], []>} : vector<8x8xbf16>, vector<8x32xbf16>, vector<8x32xf32> -> vector<8x32xf32>
    %122 = arith.addf %97, %121 : vector<8x32xf32>
    %123 = arith.addf %17, %122 : vector<8x32xf32>
    %c0_42 = arith.constant 0 : index
    %c0_43 = arith.constant 0 : index
    %124 = vector.load %arg8[%c0_42, %c0_43] : memref<1x32xf32, #tpu.memory_space<vmem>>, vector<1x32xf32>
    %125 = vector.broadcast %124 : vector<1x32xf32> to vector<8x32xf32>
    %126 = arith.addf %123, %125 : vector<8x32xf32>
    %127 = arith.truncf %126 : vector<8x32xf32> to vector<8x32xbf16>
    %c0_44 = arith.constant 0 : index
    %c0_45 = arith.constant 0 : index
    %c0_46 = arith.constant 0 : index
    %128 = vector.load %arg9[%c0_44, %c0_45, %c0_46] : memref<1x8x32xbf16, #tpu.memory_space<vmem>>, vector<1x8x32xbf16>
    %129 = vector.shape_cast %128 : vector<1x8x32xbf16> to vector<8x32xbf16>
    %130 = vector.shape_cast %127 : vector<8x32xbf16> to vector<1x8x32xbf16>
    tpu.vector_store %arg9[%c0_44, %c0_45, %c0_46], %130 {strides = array<i32>} : memref<1x8x32xbf16, #tpu.memory_space<vmem>>, vector<1x8x32xbf16>,
    return
  }
  func.func @transform_0(%arg0: i32) -> (i32, i32, i32) {
    %c0_i32 = arith.constant 0 : i32
    %c0_i32_0 = arith.constant 0 : i32
    %c0_i32_1 = arith.constant 0 : i32
    return %arg0, %c0_i32, %c0_i32_0 : i32, i32, i32
  }
  func.func @transform_1(%arg0: i32) -> (i32, i32, i32) {
    %c0_i32 = arith.constant 0 : i32
    %c0_i32_0 = arith.constant 0 : i32
    %c0_i32_1 = arith.constant 0 : i32
    return %arg0, %c0_i32, %c0_i32_0 : i32, i32, i32
  }
  func.func @transform_2(%arg0: i32) -> (i32, i32) {
    %c0_i32 = arith.constant 0 : i32
    %c0_i32_0 = arith.constant 0 : i32
    %c0_i32_1 = arith.constant 0 : i32
    return %c0_i32, %c0_i32_0 : i32, i32
  }
  func.func @transform_3(%arg0: i32) -> (i32, i32) {
    %c0_i32 = arith.constant 0 : i32
    %c0_i32_0 = arith.constant 0 : i32
    %c0_i32_1 = arith.constant 0 : i32
    return %c0_i32, %c0_i32_0 : i32, i32
  }
  func.func @transform_4(%arg0: i32) -> (i32, i32) {
    %c0_i32 = arith.constant 0 : i32
    %c0_i32_0 = arith.constant 0 : i32
    %c0_i32_1 = arith.constant 0 : i32
    return %c0_i32, %c0_i32_0 : i32, i32
  }
  func.func @transform_5(%arg0: i32) -> (i32, i32) {
    %c0_i32 = arith.constant 0 : i32
    %c0_i32_0 = arith.constant 0 : i32
    %c0_i32_1 = arith.constant 0 : i32
    return %c0_i32, %c0_i32_0 : i32, i32
  }
  func.func @transform_6(%arg0: i32) -> (i32, i32) {
    %c0_i32 = arith.constant 0 : i32
    %c0_i32_0 = arith.constant 0 : i32
    %c0_i32_1 = arith.constant 0 : i32
    return %c0_i32, %c0_i32_0 : i32, i32
  }
  func.func @transform_7(%arg0: i32) -> (i32, i32) {
    %c0_i32 = arith.constant 0 : i32
    %c0_i32_0 = arith.constant 0 : i32
    %c0_i32_1 = arith.constant 0 : i32
    return %c0_i32, %c0_i32_0 : i32, i32
  }
  func.func @transform_8(%arg0: i32) -> (i32, i32, i32) {
    %c0_i32 = arith.constant 0 : i32
    %c0_i32_0 = arith.constant 0 : i32
    %c0_i32_1 = arith.constant 0 : i32
    return %arg0, %c0_i32, %c0_i32_0 : i32, i32, i32
  }
}

</mosaic_0001>

<bundles_post_ra>
// kernel: tpu_custom_call.1
= control target key start
LH: loop header
LB: loop body
LE: loop exit
PB: predicated region body
PF: predicated region fallthrough
CT: control target
= control target key end

     0   :  { %13 = vsyncpa [#allocation3], 0  ;;  %s1945_s0 = inlined_call_operand.vmem [shape: f32[2,8,48], index: 0, kind: input, shape index: {}]   ;;  %s1946_s1 = inlined_call_operand.hbm [shape: bf16[2,8,8], index: 1, kind: input, shape index: {}]   ;;  %s1947_s2 = inlined_call_operand.vmem [shape: bf16[48,32], index: 2, kind: input, shape index: {}]   ;;  %s1948_s3 = inlined_call_operand.vmem [shape: f32[1,32], index: 3, kind: input, shape index: {}]   ;;  %s1949_s4 = inlined_call_operand.vmem [shape: bf16[32,96], index: 4, kind: input, shape index: {}]   ;;  %s1950_s5 = inlined_call_operand.vmem [shape: f32[1,96], index: 5, kind: input, shape index: {}]   ;;  %s1951_s6 = inlined_call_operand.vmem [shape: bf16[32,32], index: 6, kind: input, shape index: {}]   ;;  %s1952_s7 = inlined_call_operand.vmem [shape: f32[1,32], index: 7, kind: input, shape index: {}]   ;;  %s1953_s8 = inlined_call_operand.hbm [shape: bf16[2,8,32], index: 8, kind: output, shape index: {}]  }
   0x1   :  { %15 = vsyncpa [#allocation3 + $0x1], 0 }
   0x2   :  { %16 = vsyncpa [#allocation4], 0 }
   0x3   :  { %18 = vsyncpa [#allocation4 + $0x1], 0  ;;  %s1631_s27 = smov 0   ;;  %s1633_s28 = smov 0  }
   0x4   :  { %s1635_s29 = smov 0   ;;  %s1637_s30 = smov 0  }
   0x5 LB: > { %s1652_s9 = sadd.s32 4294967295, %s1569_s30   ;;  %s1235_s10 = sadd.s32 4294967294, %s1569_s30   ;;  %s1569_s30 = sphi %s1637_s30, %s1970_s30   ;;  %s1565_s29 = sphi %s1635_s29, %s1969_s29   ;;  %s1561_s28 = sphi %s1633_s28, %s1968_s28   ;;  %s1557_s27 = sphi %s1631_s27, %s1967_s27  }
   0x6   : > { %s1656_s11 = sadd.s32 1, %s1569_s30   ;;  %s57_s12 = sadd.s32 1, %s1565_s29 }
   0x7   : > { %s54_s13 = ssub.s32 %s1569_s30, %s1656_s11  ;;  %p64_p0 = scmp.ne.s32.totalorder %s1565_s29, %s1561_s28 }
   0x8   : > { %p55_p1 = scmp.eq.s32.totalorder %s54_s13, 0  ;;  %p65_p2 = scmp.eq.s32.totalorder %s1569_s30, 0 }
   0x9   : > { %p70_p3 = scmp.ne.s32.totalorder %s1561_s28, %s1557_s27  ;;  %p71_p4 = scmp.eq.s32.totalorder %s1652_s9, 0 }
   0xa   : > { %s1668_s14 = scalar_select %p55_p1, %s1565_s29, %s57_s12  }
   0xb   : > { %p1670_p5 = por %p65_p2, %p64_p0  ;;  %p1674_p6 = por %p71_p4, %p70_p3 }
   0xc   : > { %p220_p7 = scmp.eq.s32.totalorder %s1652_s9, 1  ;;  %p226_p8 = scmp.eq.s32.totalorder %s1235_s10, 1 }
   0xd   : > { %p1403_p10 = scmp.lt.s32.totalorder %s1569_s30, 2  ;;  %s271_s19 = sand.u32 1, %s1565_s29  }
   0xe   : > { %p1681_p11 = por %p220_p7, %p64_p0  ;;  %p1685_p12 = por %p226_p8, %p70_p3 }
   0xf   : > { %s1239_s20 = sshll.u32 %s1569_s30, 6  ;;  %s1238_s21 = sshll.u32 %s271_s19, 2 }
  0x10   : > { %s1958_s17 = scalar_select %p1681_p11, 1, 0 }
  0x11   : > { %s1959_s18 = scalar_select %p1685_p12, 1, 0 }
  0x12   : > { %s1694_s24 = scalar_lea.hbm %s1946_s1, %s1239_s20  ;;  %s275_s25 = scalar_lea.vmem [#allocation2], %s1238_s21 }
  0x13   : > { %s282_s26 = sshll.u32 %s275_s25, 4  ;;  %p1698_p13 = pnand %p1403_p10, %p1670_p5  ;;  %s1702_s26 = int_to_ptr.vmem [resolvable:$true] %s282_s26 }
  0x14   : > { %s272_s12 = scalar_lea.sflag [#allocation3], %s271_s19  ;;  %s1473_s13 = scalar_lea.hbm %s1694_s24, 64 }
  0x15   : > { %p1474_p2 = scmp.ne.s32.totalorder %s1694_s24, %s1473_s13  ;;  %p1475_p3 = pneg %p1698_p13 }
  0x16   : > { %s1478_s21 = scalar_lea.hbm %s1946_s1, 128  ;;  %p1479_p5 = scmp.lt.u32.totalorder %s1694_s24, %s1946_s1 }
  0x17   : > { %p1476_p4 = pnand %p1475_p3, %p1474_p2  ;;  %p1480_p8 = scmp.lt.u32.totalorder %s1478_s21, %s1473_s13 }
  0x18   : > { %p1482_p9 = scmp.lt.u32.totalorder %s1473_s13, %s1694_s24 }
  0x19   : > { %p1477_p7 = pneg %p1476_p4  ;;  %p1481_p10 = por %p1480_p8, %p1479_p5 }
  0x1b   : > { %p1483_p0 = por %p1482_p9, %p1481_p10 }
  0x1d   : > { %p1484_p1 = pnand %p1483_p0, %p1477_p7 }
  0x1f   : > { %1487 = shalt.err (!%p1484_p1)
}
  0x20   : > { %s1488_s19 = scalar_lea.vmem %s1702_s26, 64  ;;  %s1571_s25 = smov [#allocation2]  }
  0x21   : > { %p1489_p2 = scmp.ne.s32.totalorder %s1702_s26, %s1488_s19  ;;  %s1493_s15 = sshll.u32 %s1571_s25, 4  ;;  %s1494_s15 = int_to_ptr.vmem [resolvable:$false] %s1493_s15 }
  0x22   : > { %s1495_s20 = scalar_lea.vmem %s1494_s15, 128  ;;  %p1496_p11 = scmp.lt.s32.totalorder %s1702_s26, %s1494_s15 }
  0x23   : > { %p1491_p4 = pnand %p1489_p2, %p1475_p3  ;;  %p1497_p5 = scmp.lt.s32.totalorder %s1495_s20, %s1488_s19 }
  0x25   : > { %p1492_p12 = pneg %p1491_p4  ;;  %p1498_p8 = por %p1497_p5, %p1496_p11 }
  0x27   : > { %p1499_p9 = pnand %p1498_p8, %p1492_p12 }
  0x29   : > { %1502 = shalt.err (!%p1499_p9)
}
  0x2a   : > { %1398 = dma.hbm_to_vmem [thread:$0]  (!%p1698_p13), %s1694_s24, 64, %s1702_s26, %s272_s12  }
  0x2b   : > { %p1961_p0 = scmp.lt.s32.totalorder %s1569_s30, 3  ;;  %p1962_p1 = scmp.ge.s32.totalorder %s1569_s30, 1 }
  0x2d   : > { %p288_p3 = pnand %p1962_p1, %p1961_p0 }
  0x2e   : > { %s1736_s13 = sand.u32 (!%p288_p3), 1, %s1561_s28  }
  0x2f   : > { %291 = sbr.rel (%p288_p3) target bundleno = 2917 (0xb65), region = 52  ;;  %s1955_s21 = sshll.u32 (!%p288_p3), %s1736_s13, 2 }
  0x30   : > { %s294_s22 = scalar_lea.sflag (!%p288_p3), [#allocation3], %s1736_s13  ;;  %s1742_s10 = scalar_lea.vmem (!%p288_p3), [#allocation2], %s1955_s21 }
  0x36   : > { %1548 = dma.done.wait (%p1674_p6), %s294_s22, 64  }
  0x37   : > { %1550 = vsyncadd (%p1674_p6), %s294_s22, 4294967232  ;;  %p334_p11 = scmp.lt.s32.totalorder %s1652_s9, 1  ;;  %v1572_v0 = vmov 0.0   ;;  %vm1573_vm0 = vmmov 0   ;;  %v1450_v1 = vld [vmem:[%s1947_s2] sm:$0xff]   ;;  %v1451_v2 = vld [vmem:[%s1947_s2 + $0x8] sm:$0xff]  }
  0x38   : > { %1301 = vmatprep.subr.bf16.mxu0 %v1572_v0  ;;  %1307 = vmatprep.mubr.msk.bf16.mxu0 %vm1573_vm0, %v1572_v0  ;;  %v1452_v3 = vld [vmem:[%s1947_s2 + $0x10] sm:$0xff]   ;;  %vm373_vm1 = vcmask 392192   ;;  %v1453_v6 = vld [vmem:[%s1949_s4] sm:$0xff]   ;;  %v1454_v7 = vld [vmem:[%s1949_s4 + $0x8] sm:$0xff]   ;;  %vm446_vm2 = vcmask 261120   ;;  %s1574_s15 = smov 120  }
  0x39   : > { %1311 = vmatprep.subr.bf16.mxu1 %v1572_v0  ;;  %1315 = vmatprep.mubr.msk.bf16.mxu1 %vm1573_vm0, %v1572_v0  ;;  %s335_s24 = scalar_select %p334_p11, %s1652_s9, 1  ;;  %v1244_v8 = vld [vmem:[%s1948_s3] ss:$0 sm:$0xff]  ;;  %vm495_vm3 = vcmask 64512   ;;  %vm559_vm4 = vcmask 1043456   ;;  %vm1137_vm5 = vcmask 257024  }
  0x3a   : > { %1302 = vmatpush3.bf16.msra.mxu0 %v1450_v1  ;;  %1312 = vmatpush3.bf16.msra.mxu1 %v1453_v6  ;;  %v1249_v20 = vld [vmem:[%s1950_s5] ss:$0 sm:$0xff]  ;;  %s1576_s22 = smov 88   ;;  %s1579_s26 = smov 112  }
  0x3b   : > { %s1243_s16 = sshll.u32 %s335_s24, 3  ;;  %1303 = vmatprep.subr.bf16.mxu0 %v1572_v0  ;;  %1313 = vmatprep.subr.bf16.mxu1 %v1572_v0  ;;  %v340_v32 = vld [vmem:[%s1742_s10] sm:$0xf]  ;;  %s1577_s10 = smov 64  }
  0x3c   : > { %s337_s20 = scalar_lea.vmem %s1945_s0, %s1243_s16  ;;  %v1810_v33 = vunpack.c.l.bf16 %v340_v32  ;;  %s1578_s24 = smov 56  }
  0x3d   : > { %v339_v4 = vld [vmem:[%s337_s20] sm:$0xff]  ;;  %s1575_s20 = smov 96   ;;  %s1580_s21 = smov 80  }
  0x3e   : > { %1304 = vmatpush3.bf16.msra.mxu0 %v1451_v2  ;;  %v341_v5 = vpack.c.bf16 %v339_v4, %v339_v4  ;;  %1314 = vmatpush3.bf16.msra.mxu1 %v1454_v7  ;;  %v716_v7 = vld [vmem:[%s1951_s6 + $0x4] sm:$0xf]  ;;  %s1581_s25 = smov 72   ;;  %s1267_s23 = sshll.u32 %s1652_s9, 6 }
  0x3f   : > { %1305 = vmatprep.subr.bf16.mxu0 %v1572_v0  ;;  %1319 = vmatprep.subr.bf16.mxu1 %v1572_v0  ;;  %s1963_s19 = sshll.u32 %s1736_s13, 2  ;;  %p1964_p12 = scmp.ne.s32.totalorder %s1958_s17, 0 }
  0x40   : > { %s1585_s9 = smov [#allocation5]  }
  0x42   : > { %1306 = vmatpush3.bf16.msra.mxu0 %v1452_v3 }
  0x43   : > { %1325 = vmatprep.subr.bf16.mxu0 %v1572_v0 }
  0x45   : > { %1308 = vmatmul.mubr.msk.bf16.vlgmr.msra.gmra.mrb[0].mxu0 %vm373_vm1, %v341_v5  ;;  %v604_v5 = vld [vmem:[%s1951_s6] sm:$0xf] }
  0x46   : > { %1327 = vmatprep.mubr.msk.bf16.mxu0 %vm1573_vm0, %v1572_v0  ;;  %v767_v6 = vsel %vm559_vm4, %v604_v5, 0 }
 0x118   : > { %v411_v9 = vpop.f32.mrb[0].mxu0 }
 0x119   : > { %v412_v10 = vadd.f32 %v1244_v8, %v411_v9  ;;  %v1309_v11 = vpop.f32.mrb[1].mxu0  ;;  %v721_v8 = vsel %vm559_vm4, %v716_v7, 0 }
 0x11a   : > { %v414_v12 = vpop.f32.mrb[2].mxu0 }
 0x11b   : > { %v418_v13 = vmul.f32 0.70710677, %v412_v10  ;;  %v1310_v14 = vpop.f32.mrb[3].mxu0  ;;  %v417_v16 = vmul.f32 0.5, %v412_v10 }
 0x11d   : > { %1455 = verf.f32 %v418_v13 }
 0x127   : > { %v1456_v15 = vpop.eup %1455 }
 0x128   : > { %v420_v17 = vadd.f32 1.0, %v1456_v15 }
 0x12a   : > { %v1784_v18 = vmul.f32 %v420_v17, %v417_v16 }
 0x12c   : > { %v422_v19 = vpack.c.bf16 %v1784_v18, %v1784_v18 }
 0x12e   : > { %1316 = vmatmul.mubr.msk.bf16.vlgmr.msra.gmra.mrb[0].mxu1 %vm446_vm2, %v422_v19 }
 0x12f   : > { %1321 = vmatprep.mubr.msk.bf16.mxu1 %vm1573_vm0, %v1572_v0 }
 0x201   : > { %v484_v21 = vpop.f32.mrb[0].mxu1 }
 0x202   : > { %v485_v22 = vadd.f32 %v1249_v20, %v484_v21  ;;  %v1317_v23 = vpop.f32.mrb[1].mxu1 }
 0x203   : > { %v487_v24 = vpop.f32.mrb[2].mxu1 }
 0x204   : > { %v1793_v25 = vpack.c.bf16 %v485_v22, %v485_v22  ;;  %v1318_v26 = vpop.f32.mrb[3].mxu1 }
 0x206   : > { %605 = vrot.lane.b32.xlu1 %v1793_v25, %s1574_s15  ;;  %493 = vrot.lane.b32.xlu0 %v1793_v25, %s1575_s20  ;;  %s1582_s15 = smov 104   ;;  %s1583_s20 = smov 48  }
 0x20a   : > { %607 = vrot.lane.b32.xlu0 %v1793_v25, %s1576_s22 }
 0x278   : > { %v494_v27 = vpop.permute.xlu0 %493  ;;  %v606_v31 = vpop.permute.xlu1 %605 }
 0x279   : > { %v500_v28 = vsel %vm495_vm3, %v494_v27, 0 }
 0x27a   : > { %1320 = vmatpush3.bf16.xpose.msra.mxu1 %v500_v28 }
 0x27b   : > { %1331 = vmatprep.subr.bf16.mxu1 %v1572_v0 }
 0x27c   : > { %v608_v29 = vpop.permute.xlu0 %607 }
 0x27d   : > { %v613_v30 = vsel %vm495_vm3, %v608_v29, 0 }
 0x281   : > { %1322 = vmatmul.mubr.msk.bf16.vlgmr.msra.gmra.mrb[4].mxu1 %vm495_vm3, %v1793_v25 }
 0x282   : > { %1332 = vmatpush3.bf16.xpose.msra.mxu1 %v613_v30  ;;  %1333 = vmatprep.mubr.msk.bf16.mxu1 %vm1573_vm0, %v1572_v0 }
 0x283   : > { %1343 = vmatprep.subr.bf16.mxu1 %v1572_v0 }
 0x289   : > { %1334 = vmatmul.mubr.msk.bf16.vlgmr.msra.gmra.mrb[8].mxu1 %vm495_vm3, %v606_v31 }
 0x28a   : > { %1345 = vmatprep.mubr.msk.bf16.mxu1 %vm1573_vm0, %v1572_v0  ;;  %1344 = vmatpush3.bf16.msra.mxu1 %v721_v8 }
 0x28b   : > { %1355 = vmatprep.subr.bf16.mxu1 %v1572_v0 }
 0x354   : > { %v536_v34 = vpop.f32.mrb[4].mxu1 }
 0x355   : > { %v537_v35 = vadd.f32 %v536_v34, %v1810_v33  ;;  %v1323_v36 = vpop.f32.mrb[5].mxu1 }
 0x356   : > { %v539_v37 = vpop.f32.mrb[6].mxu1 }
 0x357   : > { %v1324_v38 = vpop.f32.mrb[7].mxu1  ;;  %v542_v39 = vsel %vm495_vm3, %v537_v35, -inf }
 0x358   : > { %543 = vmax.xlane.f32.xlu1 %v542_v39 }
 0x35c   : > { %v649_v40 = vpop.f32.mrb[8].mxu1 }
 0x35d   : > { %v650_v41 = vadd.f32 %v649_v40, %v1810_v33  ;;  %v1335_v42 = vpop.f32.mrb[9].mxu1 }
 0x35e   : > { %v652_v43 = vpop.f32.mrb[10].mxu1 }
 0x35f   : > { %v1336_v44 = vpop.f32.mrb[11].mxu1  ;;  %v655_v45 = vsel %vm495_vm3, %v650_v41, -inf }
 0x360   : > { %656 = vmax.xlane.f32.xlu0 %v655_v45 }
 0x3e5   : > { %v544_v46 = vpop.xlane.xlu1 %543 }
 0x3e6   : > { %v545_v47 = vsub.f32 %v537_v35, %v544_v46 }
 0x3e8   : > { %v546_v48 = vmul.f32 1.442695, %v545_v47 }
 0x3ea   : > { %1457 = vpow2.f32 %v546_v48 }
 0x3ed   : > { %v657_v49 = vpop.xlane.xlu0 %656 }
 0x3ee   : > { %v658_v50 = vsub.f32 %v650_v41, %v657_v49 }
 0x3f0   : > { %v659_v51 = vmul.f32 1.442695, %v658_v50 }
 0x3f2   : > { %1459 = vpow2.f32 %v659_v51 }
 0x3f4   : > { %v1458_v52 = vpop.eup %1457 }
 0x3f5   : > { %v548_v53 = vsel %vm495_vm3, %v1458_v52, 0.0 }
 0x3f6   : > { %549 = vadd.xlane.f32.xlu0 %v548_v53 }
 0x3fc   : > { %v1460_v54 = vpop.eup %1459 }
 0x3fd   : > { %v661_v55 = vsel %vm495_vm3, %v1460_v54, 0.0 }
 0x3fe   : > { %662 = vadd.xlane.f32.xlu1 %v661_v55 }
 0x40c   : > { %554 = vrot.lane.b32.xlu0 %v1793_v25, %s1577_s10  ;;  %s1901_s10 = scalar_lea.hbm %s1953_s8, %s1267_s23 }
 0x40f   : > { %667 = vrot.lane.b32.xlu1 %v1793_v25, %s1578_s24  ;;  %s1584_s24 = smov 40  }
 0x410   : > { %809 = vrot.lane.b32.xlu0 %v1793_v25, %s1579_s26 }
 0x413   : > { %811 = vrot.lane.b32.xlu1 %v1793_v25, %s1580_s21  ;;  %s1507_s21 = sshll.u32 %s1585_s9, 4  ;;  %s1508_s21 = int_to_ptr.vmem [resolvable:$false] %s1507_s21 }
 0x414   : > { %s1509_s12 = scalar_lea.vmem %s1508_s21, 128 }
 0x483   : > { %v550_v56 = vpop.xlane.xlu0 %549 }
 0x484   : > { %1461 = vrcp.f32 %v550_v56 }
 0x487   : > { %v555_v57 = vpop.permute.xlu0 %554 }
 0x488   : > { %v561_v58 = vsel %vm559_vm4, %v555_v57, 0 }
 0x489   : > { %1326 = vmatpush3.bf16.msra.mxu0 %v561_v58 }
 0x48a   : > { %1337 = vmatprep.subr.bf16.mxu0 %v1572_v0 }
 0x48b   : > { %v663_v59 = vpop.xlane.xlu1 %662  ;;  %v810_v22 = vpop.permute.xlu0 %809 }
 0x48c   : > { %1463 = vrcp.f32 %v663_v59 }
 0x48e   : > { %v1462_v60 = vpop.eup %1461 }
 0x48f   : > { %v552_v61 = vmul.f32 %v1462_v60, %v1458_v52  ;;  %v668_v62 = vpop.permute.xlu1 %667 }
 0x490   : > { %v673_v1 = vsel %vm559_vm4, %v668_v62, 0 }
 0x491   : > { %v553_v63 = vpack.c.bf16 %v552_v61, %v552_v61 }
 0x493   : > { %1328 = vmatmul.mubr.msk.bf16.vlgmr.msra.gmra.mrb[4].mxu0 %vm495_vm3, %v553_v63  ;;  %v812_v14 = vpop.permute.xlu1 %811 }
 0x494   : > { %1338 = vmatpush3.bf16.msra.mxu0 %v673_v1  ;;  %1339 = vmatprep.mubr.msk.bf16.mxu0 %vm1573_vm0, %v1572_v0  ;;  %v817_v20 = vsel %vm495_vm3, %v812_v14, 0 }
 0x495   : > { %1349 = vmatprep.subr.bf16.mxu0 %v1572_v0 }
 0x496   : > { %v1464_v2 = vpop.eup %1463 }
 0x497   : > { %v665_v3 = vmul.f32 %v1464_v2, %v1460_v54  ;;  %v920_v54 = vld [vmem:[%s1951_s6 + $0x8] sm:$0xf] }
 0x498   : > { %v925_v55 = vsel %vm559_vm4, %v920_v54, 0 }
 0x499   : > { %v666_v4 = vpack.c.bf16 %v665_v3, %v665_v3 }
 0x49b   : > { %1340 = vmatmul.mubr.msk.bf16.vlgmr.msra.gmra.mrb[8].mxu0 %vm495_vm3, %v666_v4 }
 0x49c   : > { %1351 = vmatprep.mubr.msk.bf16.mxu0 %vm1573_vm0, %v1572_v0  ;;  %1350 = vmatpush3.bf16.msra.mxu0 %v767_v6 }
 0x49d   : > { %1361 = vmatprep.subr.bf16.mxu0 %v1572_v0 }
 0x566   : > { %v597_v9 = vpop.f32.mrb[4].mxu0 }
 0x567   : > { %v603_v10 = vpack.c.bf16 %v597_v9, %v597_v9  ;;  %v1329_v11 = vpop.f32.mrb[5].mxu0  ;;  %v1079_v9 = vld [vmem:[%s1951_s6 + $0xc] sm:$0xf] }
 0x568   : > { %v600_v12 = vpop.f32.mrb[6].mxu0 }
 0x569   : > { %v1330_v13 = vpop.f32.mrb[7].mxu0  ;;  %1352 = vmatmul.mubr.msk.bf16.vlgmr.msra.gmra.mrb[12].mxu0 %vm495_vm3, %v603_v10  ;;  %v1084_v10 = vsel %vm559_vm4, %v1079_v9, 0 }
 0x56a   : > { %1363 = vmatprep.mubr.msk.bf16.mxu0 %vm1573_vm0, %v1572_v0 }
 0x56e   : > { %v709_v15 = vpop.f32.mrb[8].mxu0 }
 0x56f   : > { %v715_v16 = vpack.c.bf16 %v709_v15, %v709_v15  ;;  %v1341_v17 = vpop.f32.mrb[9].mxu0 }
 0x570   : > { %v712_v19 = vpop.f32.mrb[10].mxu0 }
 0x571   : > { %v1342_v21 = vpop.f32.mrb[11].mxu0  ;;  %1346 = vmatmul.mubr.msk.bf16.vlgmr.msra.gmra.mrb[12].mxu1 %vm495_vm3, %v715_v16 }
 0x572   : > { %1356 = vmatpush3.bf16.xpose.msra.mxu1 %v817_v20  ;;  %1357 = vmatprep.mubr.msk.bf16.mxu1 %vm1573_vm0, %v1572_v0 }
 0x573   : > { %1367 = vmatprep.subr.bf16.mxu1 %v1572_v0 }
 0x579   : > { %1358 = vmatmul.mubr.msk.bf16.vlgmr.msra.gmra.mrb[16].mxu1 %vm495_vm3, %v810_v22 }
 0x57a   : > { %1369 = vmatprep.mubr.msk.bf16.mxu1 %vm1573_vm0, %v1572_v0  ;;  %1368 = vmatpush3.bf16.msra.mxu1 %v925_v55 }
 0x57b   : > { %1379 = vmatprep.subr.bf16.mxu1 %v1572_v0 }
 0x63c   : > { %v803_v23 = vpop.f32.mrb[12].mxu0 }
 0x63d   : > { %v1353_v24 = vpop.f32.mrb[13].mxu0 }
 0x63e   : > { %v806_v26 = vpop.f32.mrb[14].mxu0 }
 0x63f   : > { %v1354_v27 = vpop.f32.mrb[15].mxu0 }
 0x644   : > { %v757_v28 = vpop.f32.mrb[12].mxu1 }
 0x645   : > { %v1853_v29 = vadd.f32 %v803_v23, %v757_v28  ;;  %v1347_v30 = vpop.f32.mrb[13].mxu1 }
 0x646   : > { %v760_v31 = vpop.f32.mrb[14].mxu1 }
 0x647   : > { %v1348_v32 = vpop.f32.mrb[15].mxu1 }
 0x64c   : > { %v853_v34 = vpop.f32.mrb[16].mxu1 }
 0x64d   : > { %v854_v35 = vadd.f32 %v853_v34, %v1810_v33  ;;  %v1359_v36 = vpop.f32.mrb[17].mxu1 }
 0x64e   : > { %v856_v37 = vpop.f32.mrb[18].mxu1 }
 0x64f   : > { %v1360_v38 = vpop.f32.mrb[19].mxu1  ;;  %v859_v39 = vsel %vm495_vm3, %v854_v35, -inf }
 0x650   : > { %860 = vmax.xlane.f32.xlu1 %v859_v39 }
 0x661   : > { %970 = vrot.lane.b32.xlu1 %v1793_v25, %s1581_s25  ;;  %s333_s25 = scalar_lea.vmem [#allocation5], %s1963_s19 }
 0x665   : > { %968 = vrot.lane.b32.xlu1 %v1793_v25, %s1582_s15  ;;  %s1153_s15 = sshll.u32 %s333_s25, 4  ;;  %s1903_s15 = int_to_ptr.vmem [resolvable:$true] %s1153_s15 }
 0x666   : > { %s1503_s26 = scalar_lea.vmem %s1903_s15, 64  ;;  %p1510_p10 = scmp.lt.s32.totalorder %s1903_s15, %s1508_s21 }
 0x667   : > { %p1504_p6 = scmp.ne.s32.totalorder %s1903_s15, %s1503_s26  ;;  %p1511_p2 = scmp.lt.s32.totalorder %s1509_s12, %s1503_s26 }
 0x669   : > { %p1505_p13 = pnand %p1504_p6, %p1964_p12  ;;  %p1512_p4 = por %p1511_p2, %p1510_p10 }
 0x66b   : > { %p1506_p7 = pneg %p1505_p13 }
 0x66d   : > { %p1513_p5 = pnand %p1512_p4, %p1506_p7 }
 0x6dd   : > { %v861_v40 = vpop.xlane.xlu1 %860 }
 0x6de   : > { %v862_v41 = vsub.f32 %v854_v35, %v861_v40 }
 0x6e0   : > { %v863_v42 = vmul.f32 1.442695, %v862_v41 }
 0x6e1   : > { %v971_v50 = vpop.permute.xlu1 %970 }
 0x6e2   : > { %1465 = vpow2.f32 %v863_v42  ;;  %v976_v52 = vsel %vm495_vm3, %v971_v50, 0 }
 0x6e5   : > { %v969_v53 = vpop.permute.xlu1 %968 }
 0x6ec   : > { %v1466_v43 = vpop.eup %1465 }
 0x6ed   : > { %v865_v44 = vsel %vm495_vm3, %v1466_v43, 0.0 }
 0x6ee   : > { %866 = vadd.xlane.f32.xlu0 %v865_v44 }
 0x704   : > { %871 = vrot.lane.b32.xlu0 %v1793_v25, %s1583_s20 }
 0x77b   : > { %v867_v45 = vpop.xlane.xlu0 %866 }
 0x77c   : > { %1467 = vrcp.f32 %v867_v45 }
 0x77f   : > { %v872_v46 = vpop.permute.xlu0 %871 }
 0x780   : > { %v877_v47 = vsel %vm559_vm4, %v872_v46, 0 }
 0x781   : > { %1362 = vmatpush3.bf16.msra.mxu0 %v877_v47 }
 0x782   : > { %1373 = vmatprep.subr.bf16.mxu0 %v1572_v0 }
 0x786   : > { %v1468_v48 = vpop.eup %1467 }
 0x787   : > { %v869_v49 = vmul.f32 %v1468_v48, %v1466_v43 }
 0x789   : > { %v870_v51 = vpack.c.bf16 %v869_v49, %v869_v49 }
 0x78b   : > { %1364 = vmatmul.mubr.msk.bf16.vlgmr.msra.gmra.mrb[16].mxu0 %vm495_vm3, %v870_v51 }
 0x78c   : > { %1374 = vmatpush3.bf16.xpose.msra.mxu0 %v976_v52  ;;  %1375 = vmatprep.mubr.msk.bf16.mxu0 %vm1573_vm0, %v1572_v0 }
 0x78d   : > { %1385 = vmatprep.subr.bf16.mxu0 %v1572_v0 }
 0x793   : > { %1376 = vmatmul.mubr.msk.bf16.vlgmr.msra.gmra.mrb[20].mxu0 %vm495_vm3, %v969_v53 }
 0x794   : > { %1387 = vmatprep.mubr.msk.bf16.mxu0 %vm1573_vm0, %v1572_v0  ;;  %1386 = vmatpush3.bf16.msra.mxu0 %v1084_v10 }
 0x85e   : > { %v913_v56 = vpop.f32.mrb[16].mxu0 }
 0x85f   : > { %v919_v57 = vpack.c.bf16 %v913_v56, %v913_v56  ;;  %v1365_v58 = vpop.f32.mrb[17].mxu0 }
 0x860   : > { %v916_v59 = vpop.f32.mrb[18].mxu0 }
 0x861   : > { %v1366_v60 = vpop.f32.mrb[19].mxu0  ;;  %1370 = vmatmul.mubr.msk.bf16.vlgmr.msra.gmra.mrb[20].mxu1 %vm495_vm3, %v919_v57 }
 0x862   : > { %1381 = vmatprep.mubr.msk.bf16.mxu1 %vm1573_vm0, %v1572_v0 }
 0x866   : > { %v1012_v61 = vpop.f32.mrb[20].mxu0 }
 0x867   : > { %v1013_v62 = vadd.f32 %v1012_v61, %v1810_v33  ;;  %v1377_v63 = vpop.f32.mrb[21].mxu0 }
 0x868   : > { %v1015_v1 = vpop.f32.mrb[22].mxu0 }
 0x869   : > { %v1378_v2 = vpop.f32.mrb[23].mxu0  ;;  %v1018_v3 = vsel %vm495_vm3, %v1013_v62, -inf }
 0x86a   : > { %1019 = vmax.xlane.f32.xlu0 %v1018_v3 }
 0x880   : > { %1030 = vrot.lane.b32.xlu0 %v1793_v25, %s1584_s24  ;;  %s1140_s24 = scalar_lea.sflag [#allocation4], %s1736_s13 }
 0x8f7   : > { %v1020_v4 = vpop.xlane.xlu0 %1019 }
 0x8f8   : > { %v1021_v5 = vsub.f32 %v1013_v62, %v1020_v4 }
 0x8fa   : > { %v1022_v6 = vmul.f32 1.442695, %v1021_v5 }
 0x8fb   : > { %v1031_v7 = vpop.permute.xlu0 %1030 }
 0x8fc   : > { %1469 = vpow2.f32 %v1022_v6  ;;  %v1036_v8 = vsel %vm559_vm4, %v1031_v7, 0 }
 0x8fd   : > { %1380 = vmatpush3.bf16.msra.mxu1 %v1036_v8 }
 0x906   : > { %v1470_v0 = vpop.eup %1469 }
 0x907   : > { %v1024_v33 = vsel %vm495_vm3, %v1470_v0, 0.0 }
 0x908   : > { %1025 = vadd.xlane.f32.xlu1 %v1024_v33 }
 0x934   : > { %v961_v25 = vpop.f32.mrb[20].mxu1 }
 0x935   : > { %v967_v11 = vadd.f32 %v961_v25, %v1853_v29  ;;  %v1371_v12 = vpop.f32.mrb[21].mxu1  ;;  %v1265_v29 = vld [vmem:[%s1952_s7] ss:$0 sm:$0xff] }
 0x936   : > { %v964_v13 = vpop.f32.mrb[22].mxu1 }
 0x937   : > { %v1372_v14 = vpop.f32.mrb[23].mxu1 }
 0x995   : > { %v1026_v15 = vpop.xlane.xlu1 %1025 }
 0x996   : > { %1471 = vrcp.f32 %v1026_v15 }
 0x9a0   : > { %v1472_v16 = vpop.eup %1471 }
 0x9a1   : > { %v1028_v17 = vmul.f32 %v1472_v16, %v1470_v0 }
 0x9a3   : > { %v1029_v19 = vpack.c.bf16 %v1028_v17, %v1028_v17 }
 0x9a5   : > { %1382 = vmatmul.mubr.msk.bf16.vlgmr.msra.gmra.mrb[24].mxu1 %vm495_vm3, %v1029_v19 }
 0xa78   : > { %v1072_v20 = vpop.f32.mrb[24].mxu1 }
 0xa79   : > { %v1078_v21 = vpack.c.bf16 %v1072_v20, %v1072_v20  ;;  %v1383_v22 = vpop.f32.mrb[25].mxu1 }
 0xa7a   : > { %v1075_v23 = vpop.f32.mrb[26].mxu1 }
 0xa7b   : > { %v1384_v24 = vpop.f32.mrb[27].mxu1  ;;  %1388 = vmatmul.mubr.msk.bf16.vlgmr.msra.gmra.mrb[24].mxu0 %vm495_vm3, %v1078_v21 }
 0xb4e   : > { %v1120_v26 = vpop.f32.mrb[24].mxu0 }
 0xb4f   : > { %v1126_v27 = vadd.f32 %v1120_v26, %v967_v11  ;;  %v1389_v28 = vpop.f32.mrb[25].mxu0 }
 0xb50   : > { %v1123_v30 = vpop.f32.mrb[26].mxu0 }
 0xb51   : > { %v1127_v31 = vadd.f32 %v1126_v27, %v1784_v18  ;;  %v1390_v32 = vpop.f32.mrb[27].mxu0 }
 0xb53   : > { %v1135_v34 = vadd.f32 %v1265_v29, %v1127_v31 }
 0xb55   : > { %v1136_v35 = vpack.c.bf16 %v1135_v34, %v1135_v34 }
 0xb57   : > { %1138 = vst.msk [vmem:[%s333_s25] sm:$0xf] %vm1137_vm5, %v1136_v35 }
 0xb58   : > { %1516 = shalt.err (!%p1513_p5)
}
 0xb59   : > { %s1517_s13 = scalar_lea.hbm %s1901_s10, 64  ;;  %s1521_s19 = scalar_lea.hbm %s1953_s8, 128 }
 0xb5a   : > { %p1518_p8 = scmp.ne.s32.totalorder %s1901_s10, %s1517_s13  ;;  %p1522_p1 = scmp.lt.u32.totalorder %s1901_s10, %s1953_s8 }
 0xb5b   : > { %p1523_p3 = scmp.lt.u32.totalorder %s1521_s19, %s1517_s13  ;;  %p1525_p6 = scmp.lt.u32.totalorder %s1517_s13, %s1901_s10 }
 0xb5c   : > { %p1519_p9 = pnand %p1518_p8, %p1964_p12 }
 0xb5d   : > { %p1524_p11 = por %p1523_p3, %p1522_p1 }
 0xb5e   : > { %p1520_p0 = pneg %p1519_p9 }
 0xb5f   : > { %p1526_p13 = por %p1525_p6, %p1524_p11 }
 0xb61   : > { %p1527_p7 = pnand %p1526_p13, %p1520_p0 }
 0xb63   : > { %1530 = shalt.err (!%p1527_p7)
}
 0xb64   : > { %1393 = dma.vmem_to_hbm [thread:$0]  (%p1964_p12), %s1903_s15, 64, %s1901_s10, %s1140_s24  }
 0xb65 PF: > { %s1165_s22 = sand.u32 1, %s1557_s27   ;;  %p1965_p10 = scmp.ne.s32.totalorder %s1959_s18, 0 }
 0xb66   : > { %p1966_p2 = scmp.ge.s32.totalorder %s1569_s30, 2  ;;  %s1166_s26 = scalar_lea.sflag [#allocation4], %s1165_s22 }
 0xb68   : > { %p1400_p4 = pnand %p1966_p2, %p1965_p10 }
 0xb6a   : > { %1552 = dma.done.wait (!%p1400_p4), %s1166_s26, 64  }
 0xb6b   : > { %1554 = vsyncadd (!%p1400_p4), %s1166_s26, 4294967232  ;;  %p21_p5 = scmp.ge.s32.totalorder %s1656_s11, 4   ;;  %s1967_s27 = smov %s1561_s28 }
 0xb6c   : > { %s1968_s28 = smov %s1565_s29  ;;  %s1969_s29 = smov %s1668_s14 }
 0xb6d   : > { %s1970_s30 = smov %s1656_s11  ;;  %23 = sbr.rel (!%p21_p5) target bundleno = 5 (0x5), region = 100 }
 0xb74   :  { %1171 = vsyncpa [#allocation3], 1 }
 0xb75   :  { %1173 = vsyncpa [#allocation3 + $0x1], 1 }
 0xb76   :  { %1174 = vsyncpa [#allocation4], 1 }
 0xb77   :  { %1176 = vsyncpa [#allocation4 + $0x1], 1 }

</bundles_post_ra>
